<compile_context>
chip_gen: v7x
topology: tpu7x:2x2x1
jax: 0.10.0
libtpu: 0.0.40
codegen_flags: <defaults>
</compile_context>

<pallas_src>
import jax
import jax.numpy as jnp
from jax.experimental import pallas as pl
from jax.experimental.pallas import tpu as pltpu


def _linear_kernel(x_ref, w_ref, b_ref, o_ref):
    # x: (TM, in_f)   w: (in_f, out_f)  (already transposed in wrapper)
    # b: (1, out_f)   o: (TM, out_f)
    y = jnp.dot(x_ref[...], w_ref[...], preferred_element_type=jnp.float32)
    o_ref[...] = (y + b_ref[...]).astype(o_ref.dtype)


def mock_model_forward(x, weight, bias, *, tm_max=1024):
    """y = x @ weight.T + bias  (equivalent to nn.Linear(10, 3).forward).

    x:      (B, in_f)
    weight: (out_f, in_f)   -- torch.nn.Linear parameter layout
    bias:   (out_f,)
    """
    B, in_f = x.shape
    out_f = weight.shape[0]

    # Layout plumbing in plain JAX (free): kill the in-kernel transpose and
    # keep the bias 2-D for TPU layout.
    w_t = weight.T.astype(x.dtype)          # (in_f, out_f)
    b2 = bias.reshape(1, out_f).astype(x.dtype)

    # Row tiling over the batch axis.  Small batches: one full-array block
    # (block_shape == array dims satisfies the (8,128) rule).  Large batches:
    # TM-row tiles (TM multiple of 8), batch padded up to a multiple of TM.
    if B <= tm_max:
        tm, b_pad = B, B
    else:
        tm = tm_max
        b_pad = pl.cdiv(B, tm) * tm

    xp = x if b_pad == B else jnp.pad(x, ((0, b_pad - B), (0, 0)))
    grid = (b_pad // tm,)

    out = pl.pallas_call(
        _linear_kernel,
        out_shape=jax.ShapeDtypeStruct((b_pad, out_f), x.dtype),
        grid_spec=pltpu.PrefetchScalarGridSpec(
            num_scalar_prefetch=0,
            grid=grid,
            in_specs=[
                # x: tiled over batch, auto double-buffered by BlockSpec.
                pl.BlockSpec((tm, in_f), lambda i: (i, 0)),
                # weight / bias: constant index_map -> DMA'd once, VMEM-resident.
                pl.BlockSpec((in_f, out_f), lambda i: (0, 0)),
                pl.BlockSpec((1, out_f), lambda i: (0, 0)),
            ],
            out_specs=pl.BlockSpec((tm, out_f), lambda i: (i, 0)),
        ),
        compiler_params=pltpu.CompilerParams(
            # Batch axis is embarrassingly parallel -> megacore sharding on v7x.
            dimension_semantics=("parallel",),
        ),
    )(xp, w_t, b2)

    return out if b_pad == B else out[:B]


if __name__ == "__main__":
    key = jax.random.PRNGKey(0)
    k_x, k_w, k_b, k_x2 = jax.random.split(key, 4)

    B, IN_F, OUT_F = 8, 10, 3

    # Deterministic synthetic parameters (same shapes as nn.Linear(10, 3)).
    x = jax.random.normal(k_x, (B, IN_F), dtype=jnp.float32)
    weight = jax.random.normal(k_w, (OUT_F, IN_F), dtype=jnp.float32) * 0.1
    bias = jax.random.normal(k_b, (OUT_F,), dtype=jnp.float32) * 0.1

    # Small-batch path (single full-array block).
    y = mock_model_forward(x, weight, bias)
    y = jax.block_until_ready(y)
    y_ref = x @ weight.T + bias
    assert y.shape == (B, OUT_F)
    assert jnp.allclose(y, y_ref, atol=1e-5), "mismatch vs reference (small B)"

    # Larger-batch path exercising the batch grid + VMEM-resident W/b.
    B2 = 2048
    x2 = jax.random.normal(k_x2, (B2, IN_F), dtype=jnp.float32)
    y2 = mock_model_forward(x2, weight, bias, tm_max=1024)
    y2 = jax.block_until_ready(y2)
    y2_ref = x2 @ weight.T + bias
    assert y2.shape == (B2, OUT_F)
    assert jnp.allclose(y2, y2_ref, atol=1e-5), "mismatch vs reference (tiled B)"

    print("KERNEL_OK")
</pallas_src>

<mosaic_0001>
module attributes {stable_mosaic.version = 11 : i64} {
  func.func @_linear_kernel(%arg0: i32, %arg1: memref<8x10xf32, #tpu.memory_space<vmem>>, %arg2: memref<10x3xf32, #tpu.memory_space<vmem>>, %arg3: memref<1x3xf32, #tpu.memory_space<vmem>>, %arg4: memref<8x3xf32, #tpu.memory_space<vmem>>) attributes {dimension_semantics = [#tpu.dimension_semantics<parallel>], iteration_bounds = array<i64: 1>, scalar_prefetch = 0 : i64, scratch_operands = 0 : i64, tpu.core_type = #tpu.core_type<tc>, window_params = [{transform_indices = @transform_0, window_bounds = array<i64: 8, 10>}, {pipeline_mode = #tpu.pipeline_mode<synchronous>, transform_indices = @transform_1, window_bounds = array<i64: 10, 3>}, {pipeline_mode = #tpu.pipeline_mode<synchronous>, transform_indices = @transform_2, window_bounds = array<i64: 1, 3>}, {transform_indices = @transform_3, window_bounds = array<i64: 8, 3>}]} {
    %c0 = arith.constant 0 : index
    %c0_0 = arith.constant 0 : index
    %0 = vector.load %arg1[%c0, %c0_0] : memref<8x10xf32, #tpu.memory_space<vmem>>, vector<8x10xf32>
    %c0_1 = arith.constant 0 : index
    %c0_2 = arith.constant 0 : index
    %1 = vector.load %arg2[%c0_1, %c0_2] : memref<10x3xf32, #tpu.memory_space<vmem>>, vector<10x3xf32>
    %cst = arith.constant dense<0.000000e+00> : vector<8x3xf32>
    %2 = tpu.matmul %0, %1, %cst {dimension_numbers = #tpu.dot_dimension_numbers<[1], [0], [0], [1], [0, 0, 1, 1], [], []>} : vector<8x10xf32>, vector<10x3xf32>, vector<8x3xf32> -> vector<8x3xf32>
    %c0_3 = arith.constant 0 : index
    %c0_4 = arith.constant 0 : index
    %3 = vector.load %arg3[%c0_3, %c0_4] : memref<1x3xf32, #tpu.memory_space<vmem>>, vector<1x3xf32>
    %4 = vector.broadcast %3 : vector<1x3xf32> to vector<8x3xf32>
    %5 = arith.addf %2, %4 : vector<8x3xf32>
    %c0_5 = arith.constant 0 : index
    %c0_6 = arith.constant 0 : index
    %6 = vector.load %arg4[%c0_5, %c0_6] : memref<8x3xf32, #tpu.memory_space<vmem>>, vector<8x3xf32>
    tpu.vector_store %arg4[%c0_5, %c0_6], %5 {strides = array<i32>} : memref<8x3xf32, #tpu.memory_space<vmem>>, vector<8x3xf32>,
    return
  }
  func.func @transform_0(%arg0: i32) -> (i32, i32) {
    %c0_i32 = arith.constant 0 : i32
    %c0_i32_0 = arith.constant 0 : i32
    return %arg0, %c0_i32 : i32, i32
  }
  func.func @transform_1(%arg0: i32) -> (i32, i32) {
    %c0_i32 = arith.constant 0 : i32
    %c0_i32_0 = arith.constant 0 : i32
    %c0_i32_1 = arith.constant 0 : i32
    return %c0_i32, %c0_i32_0 : i32, i32
  }
  func.func @transform_2(%arg0: i32) -> (i32, i32) {
    %c0_i32 = arith.constant 0 : i32
    %c0_i32_0 = arith.constant 0 : i32
    %c0_i32_1 = arith.constant 0 : i32
    return %c0_i32, %c0_i32_0 : i32, i32
  }
  func.func @transform_3(%arg0: i32) -> (i32, i32) {
    %c0_i32 = arith.constant 0 : i32
    %c0_i32_0 = arith.constant 0 : i32
    return %arg0, %c0_i32 : i32, i32
  }
}

</mosaic_0001>

<bundles_post_ra>
// kernel: tpu_custom_call.1
= control target key start
LH: loop header
LB: loop body
LE: loop exit
PB: predicated region body
PF: predicated region fallthrough
CT: control target
= control target key end

     0   :  { %vm28_vm0 = vcmask 1041408   ;;  %v129_v0 = vmov 0.0|0.0   ;;  %vm130_vm1 = vmmov 1   ;;  %vm131_vm3 = vmmov 0   ;;  %s168_s1 = inlined_call_operand.vmem [shape: f32[10,3], index: 1, kind: input, shape index: {}]   ;;  %s169_s0 = inlined_call_operand.vmem [shape: f32[8,10], index: 0, kind: input, shape index: {}]   ;;  %s170_s2 = inlined_call_operand.vmem [shape: f32[1,3], index: 2, kind: input, shape index: {}]   ;;  %s171_s3 = inlined_call_operand.vmem [shape: f32[8,3], index: 3, kind: output, shape index: {}]  }
   0x1   :  { %121 = vmatprep.subr.bf16.mxu0 %v129_v0  ;;  %v15_v1 = vld [vmem:[%s168_s1] sm:$0xff]  ;;  %v16_v2 = vld [vmem:[%s168_s1 + $0x8] sm:$0x3]  ;;  %vm123_vm2 = vmpackc.low %vm28_vm0, %vm130_vm1  ;;  %v132_v4 = vmov 0.0   ;;  %vm24_vm4 = vcmask 80896   ;;  %vm102_vm5 = vcmask 23552  }
   0x2   :  { %v122_v3 = vpack.c.bf16 %v16_v2, %v15_v1  ;;  %118 = vmatprep.mubr.msk.f32.mxu0 %vm131_vm3, %v132_v4  ;;  %v14_v5 = vld [vmem:[%s169_s0] sm:$0xff] }
   0x3   :  { %v108_v6 = vld [vmem:[%s170_s2] ss:$0 sm:$0xff] }
   0x4   :  { %124 = vmatpush3.bf16.msk.msra.mxu0 %vm123_vm2, %v122_v3 }
   0x7   :  { %119 = vmatmul.mubr.msk.f32.vlgmr.msra.gmra.mrb[0].mxu0 %vm24_vm4, %v14_v5 }
  0xda   :  { %v98_v7 = vpop.f32.mrb[0].mxu0 }
  0xdb   :  { %v99_v8 = vadd.f32 %v108_v6, %v98_v7  ;;  %v120_v9 = vpop.f32.mrb[1].mxu0 }
  0xdd   :  { %103 = vst.msk [vmem:[%s171_s3] sm:$0xff] %vm102_vm5, %v99_v8 }

</bundles_post_ra>
